<compile_context>
chip_gen: v6e
topology: v6e:2x2x1
jax: 0.10.0
libtpu: 0.0.40
codegen_flags: <defaults>
</compile_context>

<pallas_src>
import jax
import jax.numpy as jnp
from jax.experimental import pallas as pl
from jax.experimental.pallas import tpu as pltpu


def _round_up(n, m):
    return ((n + m - 1) // m) * m


def _mlp_kernel(x_ref,
                w1_ref, b1_ref,
                w2_ref, b2_ref,
                w3_ref, b3_ref,
                w4_ref, b4_ref,
                o_ref):
    """Fused MLP forward: tanh(tanh(tanh(x@W1+b1)@W2+b2)@W3+b3)@W4+b4."""
    # bf16 operands to the MXU, f32 accumulation, tanh on the EUP in f32.
    h = jnp.dot(x_ref[...], w1_ref[...],
                preferred_element_type=jnp.float32) + b1_ref[...]
    h = jnp.tanh(h).astype(jnp.bfloat16)

    h = jnp.dot(h, w2_ref[...],
                preferred_element_type=jnp.float32) + b2_ref[...]
    h = jnp.tanh(h).astype(jnp.bfloat16)

    h = jnp.dot(h, w3_ref[...],
                preferred_element_type=jnp.float32) + b3_ref[...]
    h = jnp.tanh(h).astype(jnp.bfloat16)

    out = jnp.dot(h, w4_ref[...],
                  preferred_element_type=jnp.float32) + b4_ref[...]
    o_ref[...] = out


def mlp_forward(x, params, *, tb_max=256):
    """x: (batch, input_nc, datasize) float32. Returns (batch, num_classes) f32."""
    batch = x.shape[0]
    x_flat = x.reshape(batch, -1)                 # same as torch .view(B, -1)
    in_features = x_flat.shape[1]

    (w1, b1), (w2, b2), (w3, b3), (w4, b4) = params
    num_classes = w4.shape[1]

    # Pad all matmul K / N dims to multiples of 128 (lane width) so every
    # vreg / MXU tile is full and the output store is unmasked.
    k1 = _round_up(in_features, 128)
    n_out = _round_up(num_classes, 128)

    # Batch tile: full (padded) batch if small, else 256-row tiles.
    tb = min(tb_max, _round_up(batch, 8))
    b_pad = _round_up(batch, tb)

    def pad_w(w, rows, cols):
        return jnp.pad(
            w, ((0, rows - w.shape[0]), (0, cols - w.shape[1]))
        ).astype(jnp.bfloat16)

    def pad_b(b, cols):
        return jnp.pad(b, ((0, 0), (0, cols - b.shape[1]))).astype(jnp.float32)

    w1p, b1p = pad_w(w1, k1, 128),    pad_b(b1, 128)
    w2p, b2p = pad_w(w2, 128, 128),   pad_b(b2, 128)
    w3p, b3p = pad_w(w3, 128, 128),   pad_b(b3, 128)
    w4p, b4p = pad_w(w4, 128, n_out), pad_b(b4, n_out)

    # bf16 input halves the x DMA bytes; zero-padding is exact through tanh.
    x_p = jnp.pad(
        x_flat, ((0, b_pad - batch), (0, k1 - in_features))
    ).astype(jnp.bfloat16)

    grid = (b_pad // tb,)

    def resident(shape):
        # Weight/bias blocks: same block for every grid step -> VMEM-resident.
        return pl.BlockSpec(shape, lambda i: (0, 0))

    out = pl.pallas_call(
        _mlp_kernel,
        out_shape=jax.ShapeDtypeStruct((b_pad, n_out), jnp.float32),
        grid=grid,
        in_specs=[
            pl.BlockSpec((tb, k1), lambda i: (i, 0)),   # x tile per grid step
            resident((k1, 128)),  resident((1, 128)),   # W1, b1
            resident((128, 128)), resident((1, 128)),   # W2, b2
            resident((128, 128)), resident((1, 128)),   # W3, b3
            resident((128, n_out)), resident((1, n_out)),  # W4, b4
        ],
        out_specs=pl.BlockSpec((tb, n_out), lambda i: (i, 0)),
        compiler_params=pltpu.CompilerParams(
            dimension_semantics=("parallel",)),
    )(x_p, w1p, b1p, w2p, b2p, w3p, b3p, w4p, b4p)

    return out[:batch, :num_classes]


def init_params(key, input_nc, num_classes, datasize):
    """Deterministic param init mirroring nn.Linear shapes (stored transposed, f32)."""
    in_features = input_nc * datasize
    dims = [(in_features, 128), (128, 64), (64, 64), (64, num_classes)]
    params = []
    for fan_in, fan_out in dims:
        kw, kb, key = jax.random.split(key, 3)
        bound = 1.0 / jnp.sqrt(fan_in)
        # torch Linear stores weight as (out, in); we keep (in, out) for x @ W.
        w = jax.random.uniform(kw, (fan_in, fan_out), jnp.float32, -bound, bound)
        b = jax.random.uniform(kb, (1, fan_out), jnp.float32, -bound, bound)
        params.append((w, b))
    return params


def mlp_reference(x, params):
    """Pure-JAX f32 reference matching the PyTorch module."""
    h = x.reshape(x.shape[0], -1)
    (w1, b1), (w2, b2), (w3, b3), (w4, b4) = params
    h = jnp.tanh(h @ w1 + b1)
    h = jnp.tanh(h @ w2 + b2)
    h = jnp.tanh(h @ w3 + b3)
    return h @ w4 + b4


if __name__ == "__main__":
    key = jax.random.PRNGKey(0)
    kx, kp = jax.random.split(key)

    batch, input_nc, datasize, num_classes = 2, 4, 16, 10

    x = jax.random.normal(kx, (batch, input_nc, datasize), jnp.float32)
    params = init_params(kp, input_nc, num_classes, datasize)

    out = mlp_forward(x, params)
    out = jax.block_until_ready(out)

    ref = mlp_reference(x, params)
    assert out.shape == (batch, num_classes)
    # bf16 MXU operands with f32 accumulation -> relaxed tolerance vs f32 ref.
    assert jnp.allclose(out, ref, atol=3e-2, rtol=3e-2), "mismatch vs reference"

    print("KERNEL_OK")
</pallas_src>

<mosaic_0001>
module attributes {stable_mosaic.version = 11 : i64} {
  func.func @_mlp_kernel(%arg0: i32, %arg1: memref<8x128xbf16, #tpu.memory_space<vmem>>, %arg2: memref<128x128xbf16, #tpu.memory_space<vmem>>, %arg3: memref<1x128xf32, #tpu.memory_space<vmem>>, %arg4: memref<128x128xbf16, #tpu.memory_space<vmem>>, %arg5: memref<1x128xf32, #tpu.memory_space<vmem>>, %arg6: memref<128x128xbf16, #tpu.memory_space<vmem>>, %arg7: memref<1x128xf32, #tpu.memory_space<vmem>>, %arg8: memref<128x128xbf16, #tpu.memory_space<vmem>>, %arg9: memref<1x128xf32, #tpu.memory_space<vmem>>, %arg10: memref<8x128xf32, #tpu.memory_space<vmem>>) attributes {dimension_semantics = [#tpu.dimension_semantics<parallel>], iteration_bounds = array<i64: 1>, scalar_prefetch = 0 : i64, scratch_operands = 0 : i64, tpu.core_type = #tpu.core_type<tc>, window_params = [{transform_indices = @transform_0, window_bounds = array<i64: 8, 128>}, {pipeline_mode = #tpu.pipeline_mode<synchronous>, transform_indices = @transform_1, window_bounds = array<i64: 128, 128>}, {pipeline_mode = #tpu.pipeline_mode<synchronous>, transform_indices = @transform_2, window_bounds = array<i64: 1, 128>}, {pipeline_mode = #tpu.pipeline_mode<synchronous>, transform_indices = @transform_3, window_bounds = array<i64: 128, 128>}, {pipeline_mode = #tpu.pipeline_mode<synchronous>, transform_indices = @transform_4, window_bounds = array<i64: 1, 128>}, {pipeline_mode = #tpu.pipeline_mode<synchronous>, transform_indices = @transform_5, window_bounds = array<i64: 128, 128>}, {pipeline_mode = #tpu.pipeline_mode<synchronous>, transform_indices = @transform_6, window_bounds = array<i64: 1, 128>}, {pipeline_mode = #tpu.pipeline_mode<synchronous>, transform_indices = @transform_7, window_bounds = array<i64: 128, 128>}, {pipeline_mode = #tpu.pipeline_mode<synchronous>, transform_indices = @transform_8, window_bounds = array<i64: 1, 128>}, {transform_indices = @transform_9, window_bounds = array<i64: 8, 128>}]} {
    %c0 = arith.constant 0 : index
    %c0_0 = arith.constant 0 : index
    %0 = vector.load %arg1[%c0, %c0_0] : memref<8x128xbf16, #tpu.memory_space<vmem>>, vector<8x128xbf16>
    %c0_1 = arith.constant 0 : index
    %c0_2 = arith.constant 0 : index
    %1 = vector.load %arg2[%c0_1, %c0_2] : memref<128x128xbf16, #tpu.memory_space<vmem>>, vector<128x128xbf16>
    %cst = arith.constant dense<0.000000e+00> : vector<8x128xf32>
    %2 = tpu.matmul %0, %1, %cst {dimension_numbers = #tpu.dot_dimension_numbers<[1], [0], [0], [1], [0, 0, 1, 1], [], []>} : vector<8x128xbf16>, vector<128x128xbf16>, vector<8x128xf32> -> vector<8x128xf32>
    %c0_3 = arith.constant 0 : index
    %c0_4 = arith.constant 0 : index
    %3 = vector.load %arg3[%c0_3, %c0_4] : memref<1x128xf32, #tpu.memory_space<vmem>>, vector<1x128xf32>
    %4 = vector.broadcast %3 : vector<1x128xf32> to vector<8x128xf32>
    %5 = arith.addf %2, %4 : vector<8x128xf32>
    %6 = math.tanh %5 : vector<8x128xf32>
    %7 = arith.truncf %6 : vector<8x128xf32> to vector<8x128xbf16>
    %c0_5 = arith.constant 0 : index
    %c0_6 = arith.constant 0 : index
    %8 = vector.load %arg4[%c0_5, %c0_6] : memref<128x128xbf16, #tpu.memory_space<vmem>>, vector<128x128xbf16>
    %cst_7 = arith.constant dense<0.000000e+00> : vector<8x128xf32>
    %9 = tpu.matmul %7, %8, %cst_7 {dimension_numbers = #tpu.dot_dimension_numbers<[1], [0], [0], [1], [0, 0, 1, 1], [], []>} : vector<8x128xbf16>, vector<128x128xbf16>, vector<8x128xf32> -> vector<8x128xf32>
    %c0_8 = arith.constant 0 : index
    %c0_9 = arith.constant 0 : index
    %10 = vector.load %arg5[%c0_8, %c0_9] : memref<1x128xf32, #tpu.memory_space<vmem>>, vector<1x128xf32>
    %11 = vector.broadcast %10 : vector<1x128xf32> to vector<8x128xf32>
    %12 = arith.addf %9, %11 : vector<8x128xf32>
    %13 = math.tanh %12 : vector<8x128xf32>
    %14 = arith.truncf %13 : vector<8x128xf32> to vector<8x128xbf16>
    %c0_10 = arith.constant 0 : index
    %c0_11 = arith.constant 0 : index
    %15 = vector.load %arg6[%c0_10, %c0_11] : memref<128x128xbf16, #tpu.memory_space<vmem>>, vector<128x128xbf16>
    %cst_12 = arith.constant dense<0.000000e+00> : vector<8x128xf32>
    %16 = tpu.matmul %14, %15, %cst_12 {dimension_numbers = #tpu.dot_dimension_numbers<[1], [0], [0], [1], [0, 0, 1, 1], [], []>} : vector<8x128xbf16>, vector<128x128xbf16>, vector<8x128xf32> -> vector<8x128xf32>
    %c0_13 = arith.constant 0 : index
    %c0_14 = arith.constant 0 : index
    %17 = vector.load %arg7[%c0_13, %c0_14] : memref<1x128xf32, #tpu.memory_space<vmem>>, vector<1x128xf32>
    %18 = vector.broadcast %17 : vector<1x128xf32> to vector<8x128xf32>
    %19 = arith.addf %16, %18 : vector<8x128xf32>
    %20 = math.tanh %19 : vector<8x128xf32>
    %21 = arith.truncf %20 : vector<8x128xf32> to vector<8x128xbf16>
    %c0_15 = arith.constant 0 : index
    %c0_16 = arith.constant 0 : index
    %22 = vector.load %arg8[%c0_15, %c0_16] : memref<128x128xbf16, #tpu.memory_space<vmem>>, vector<128x128xbf16>
    %cst_17 = arith.constant dense<0.000000e+00> : vector<8x128xf32>
    %23 = tpu.matmul %21, %22, %cst_17 {dimension_numbers = #tpu.dot_dimension_numbers<[1], [0], [0], [1], [0, 0, 1, 1], [], []>} : vector<8x128xbf16>, vector<128x128xbf16>, vector<8x128xf32> -> vector<8x128xf32>
    %c0_18 = arith.constant 0 : index
    %c0_19 = arith.constant 0 : index
    %24 = vector.load %arg9[%c0_18, %c0_19] : memref<1x128xf32, #tpu.memory_space<vmem>>, vector<1x128xf32>
    %25 = vector.broadcast %24 : vector<1x128xf32> to vector<8x128xf32>
    %26 = arith.addf %23, %25 : vector<8x128xf32>
    %c0_20 = arith.constant 0 : index
    %c0_21 = arith.constant 0 : index
    %27 = vector.load %arg10[%c0_20, %c0_21] : memref<8x128xf32, #tpu.memory_space<vmem>>, vector<8x128xf32>
    tpu.vector_store %arg10[%c0_20, %c0_21], %26 {strides = array<i32>} : memref<8x128xf32, #tpu.memory_space<vmem>>, vector<8x128xf32>,
    return
  }
  func.func @transform_0(%arg0: i32) -> (i32, i32) {
    %c0_i32 = arith.constant 0 : i32
    %c0_i32_0 = arith.constant 0 : i32
    return %arg0, %c0_i32 : i32, i32
  }
  func.func @transform_1(%arg0: i32) -> (i32, i32) {
    %c0_i32 = arith.constant 0 : i32
    %c0_i32_0 = arith.constant 0 : i32
    %c0_i32_1 = arith.constant 0 : i32
    return %c0_i32, %c0_i32_0 : i32, i32
  }
  func.func @transform_2(%arg0: i32) -> (i32, i32) {
    %c0_i32 = arith.constant 0 : i32
    %c0_i32_0 = arith.constant 0 : i32
    %c0_i32_1 = arith.constant 0 : i32
    return %c0_i32, %c0_i32_0 : i32, i32
  }
  func.func @transform_3(%arg0: i32) -> (i32, i32) {
    %c0_i32 = arith.constant 0 : i32
    %c0_i32_0 = arith.constant 0 : i32
    %c0_i32_1 = arith.constant 0 : i32
    return %c0_i32, %c0_i32_0 : i32, i32
  }
  func.func @transform_4(%arg0: i32) -> (i32, i32) {
    %c0_i32 = arith.constant 0 : i32
    %c0_i32_0 = arith.constant 0 : i32
    %c0_i32_1 = arith.constant 0 : i32
    return %c0_i32, %c0_i32_0 : i32, i32
  }
  func.func @transform_5(%arg0: i32) -> (i32, i32) {
    %c0_i32 = arith.constant 0 : i32
    %c0_i32_0 = arith.constant 0 : i32
    %c0_i32_1 = arith.constant 0 : i32
    return %c0_i32, %c0_i32_0 : i32, i32
  }
  func.func @transform_6(%arg0: i32) -> (i32, i32) {
    %c0_i32 = arith.constant 0 : i32
    %c0_i32_0 = arith.constant 0 : i32
    %c0_i32_1 = arith.constant 0 : i32
    return %c0_i32, %c0_i32_0 : i32, i32
  }
  func.func @transform_7(%arg0: i32) -> (i32, i32) {
    %c0_i32 = arith.constant 0 : i32
    %c0_i32_0 = arith.constant 0 : i32
    %c0_i32_1 = arith.constant 0 : i32
    return %c0_i32, %c0_i32_0 : i32, i32
  }
  func.func @transform_8(%arg0: i32) -> (i32, i32) {
    %c0_i32 = arith.constant 0 : i32
    %c0_i32_0 = arith.constant 0 : i32
    %c0_i32_1 = arith.constant 0 : i32
    return %c0_i32, %c0_i32_0 : i32, i32
  }
  func.func @transform_9(%arg0: i32) -> (i32, i32) {
    %c0_i32 = arith.constant 0 : i32
    %c0_i32_0 = arith.constant 0 : i32
    return %arg0, %c0_i32 : i32, i32
  }
}

</mosaic_0001>

<bundles_post_ra>
// kernel: tpu_custom_call.1
= control target key start
LH: loop header
LB: loop body
LE: loop exit
PB: predicated region body
PF: predicated region fallthrough
CT: control target
= control target key end

     0   :  { %14 = vsyncpa [#allocation3], 0  ;;  %s1039_s0 = inlined_call_operand.hbm [shape: bf16[8,128], index: 0, kind: input, shape index: {}]   ;;  %s1040_s1 = inlined_call_operand.hbm [shape: bf16[128,128], index: 1, kind: input, shape index: {}]   ;;  %s1041_s2 = inlined_call_operand.vmem [shape: f32[1,128], index: 2, kind: input, shape index: {}]   ;;  %s1042_s3 = inlined_call_operand.hbm [shape: bf16[128,128], index: 3, kind: input, shape index: {}]   ;;  %s1043_s4 = inlined_call_operand.vmem [shape: f32[1,128], index: 4, kind: input, shape index: {}]   ;;  %s1044_s5 = inlined_call_operand.hbm [shape: bf16[128,128], index: 5, kind: input, shape index: {}]   ;;  %s1045_s6 = inlined_call_operand.vmem [shape: f32[1,128], index: 6, kind: input, shape index: {}]   ;;  %s1046_s7 = inlined_call_operand.hbm [shape: bf16[128,128], index: 7, kind: input, shape index: {}]   ;;  %s1047_s8 = inlined_call_operand.vmem [shape: f32[1,128], index: 8, kind: input, shape index: {}]   ;;  %s1048_s9 = inlined_call_operand.hbm [shape: f32[8,128], index: 9, kind: output, shape index: {}]  }
   0x1   :  { %15 = vsyncpa [#allocation6], 0 }
   0x2   :  { %16 = vsyncpa [#allocation9], 0 }
   0x3   :  { %17 = vsyncpa [#allocation4], 0  ;;  %s897_s30 = smov [#allocation5]  }
   0x4   :  { %s33_s10 = sshll.u32 %s897_s30, 4  ;;  %s34_s10 = int_to_ptr.vmem [resolvable:$true] %s33_s10 }
   0x5   :  { %s777_s11 = scalar_lea.vmem %s34_s10, 1024  ;;  %p782_p1 = scmp.lt.s32.totalorder %s34_s10, %s34_s10 }
   0x6   :  { %p778_p0 = scmp.ne.s32.totalorder %s34_s10, %s777_s11  ;;  %p783_p2 = scmp.lt.s32.totalorder %s777_s11, %s777_s11 }
   0x8   :  { %p784_p3 = por %p783_p2, %p782_p1 }
   0xa   :  { %p785_p4 = pnand %p784_p3, %p778_p0 }
   0xc   :  { %788 = shalt.err (!%p785_p4)
}
   0xd   :  { %s898_s12 = smov 64   ;;  %s899_s13 = smov 4  }
   0xe   :  { %39 = dma.hbm_to_vmem [thread:$0]  %s1040_s1, 1024, %s34_s10, [#allocation6], %s898_s12, %s898_s12, %s899_s13  }
   0xf   :  { %s900_s16 = smov [#allocation8]   ;;  %s901_s18 = smov [#allocation2]  }
  0x10   :  { %s61_s17 = sshll.u32 %s900_s16, 4  ;;  %s24_s19 = sshll.u32 %s901_s18, 4  ;;  %s62_s17 = int_to_ptr.vmem [resolvable:$true] %s61_s17  ;;  %s25_s19 = int_to_ptr.vmem [resolvable:$true] %s24_s19 }
  0x11   :  { %s797_s20 = scalar_lea.vmem %s62_s17, 1024  ;;  %p802_p6 = scmp.lt.s32.totalorder %s62_s17, %s62_s17 }
  0x12   :  { %p798_p5 = scmp.ne.s32.totalorder %s62_s17, %s797_s20  ;;  %p803_p7 = scmp.lt.s32.totalorder %s797_s20, %s797_s20 }
  0x14   :  { %p804_p8 = por %p803_p7, %p802_p6 }
  0x16   :  { %p805_p9 = pnand %p804_p8, %p798_p5 }
  0x18   :  { %808 = shalt.err (!%p805_p9)
}
  0x19   :  { %67 = dma.hbm_to_vmem [thread:$0]  %s1044_s5, 1024, %s62_s17, [#allocation9], %s898_s12, %s898_s12, %s899_s13  }
  0x1a   :  { %s817_s1 = scalar_lea.vmem %s25_s19, 64  ;;  %p822_p11 = scmp.lt.s32.totalorder %s25_s19, %s25_s19 }
  0x1b   :  { %p818_p10 = scmp.ne.s32.totalorder %s25_s19, %s817_s1  ;;  %p823_p12 = scmp.lt.s32.totalorder %s817_s1, %s817_s1 }
  0x1d   :  { %p824_p13 = por %p823_p12, %p822_p11 }
  0x1f   :  { %p825_p0 = pnand %p824_p13, %p818_p10 }
  0x21   :  { %828 = shalt.err (!%p825_p0)
}
  0x22   :  { %27 = dma.hbm_to_vmem [thread:$0]  %s1039_s0, 64, %s25_s19, [#allocation3]  }
  0x23   :  { %s902_s25 = smov [#allocation7]   ;;  %s903_s27 = smov [#allocation10]  }
  0x24   :  { %s47_s26 = sshll.u32 %s902_s25, 4  ;;  %s75_s28 = sshll.u32 %s903_s27, 4  ;;  %s48_s26 = int_to_ptr.vmem [resolvable:$true] %s47_s26  ;;  %s76_s28 = int_to_ptr.vmem [resolvable:$true] %s75_s28 }
  0x25   :  { %s837_s29 = scalar_lea.vmem %s48_s26, 1024  ;;  %p842_p2 = scmp.lt.s32.totalorder %s48_s26, %s48_s26 }
  0x26   :  { %p838_p1 = scmp.ne.s32.totalorder %s48_s26, %s837_s29  ;;  %p843_p3 = scmp.lt.s32.totalorder %s837_s29, %s837_s29 }
  0x28   :  { %p844_p4 = por %p843_p3, %p842_p2 }
  0x2a   :  { %p845_p5 = pnand %p844_p4, %p838_p1 }
  0x2c   :  { %848 = shalt.err (!%p845_p5)
}
  0x2d   :  { %53 = dma.hbm_to_vmem [thread:$0]  %s1042_s3, 1024, %s48_s26, [#allocation6], %s898_s12, %s898_s12, %s899_s13  }
  0x2e   :  { %s857_s0 = scalar_lea.vmem %s76_s28, 1024  ;;  %p862_p7 = scmp.lt.s32.totalorder %s76_s28, %s76_s28 }
  0x2f   :  { %p858_p6 = scmp.ne.s32.totalorder %s76_s28, %s857_s0  ;;  %p863_p8 = scmp.lt.s32.totalorder %s857_s0, %s857_s0 }
  0x31   :  { %p864_p9 = por %p863_p8, %p862_p7 }
  0x33   :  { %p865_p10 = pnand %p864_p9, %p858_p6 }
  0x35   :  { %868 = shalt.err (!%p865_p10)
}
  0x36   :  { %81 = dma.hbm_to_vmem [thread:$0]  %s1046_s7, 1024, %s76_s28, [#allocation9], %s898_s12, %s898_s12, %s899_s13  }
  0x37   :  { %889 = dma.done.wait [#allocation3], 64  }
  0x38   :  { %890 = vsyncadd [#allocation3], 4294967232 }
  0x39   :  { %891 = dma.done.wait [#allocation6], 2048  }
  0x3a   :  { %892 = vsyncadd [#allocation6], 4294965248 }
  0x3b   :  { %893 = dma.done.wait [#allocation9], 2048  }
  0x3c   :  { %894 = vsyncadd [#allocation9], 4294965248  ;;  %v904_v0 = vmov 0.0   ;;  %vm905_vm0 = vmmov 0   ;;  %v731_v1 = vld [vmem:[#allocation5 + $0x38] sm:$0xff]   ;;  %v732_v2 = vld [vmem:[#allocation5 + $0x30] sm:$0xff]  }
  0x3d   :  { %641 = vmatprep.subr.bf16.mxu0 %v904_v0  ;;  %657 = vmatprep.mubr.msk.bf16.mxu0 %vm905_vm0, %v904_v0  ;;  %v733_v3 = vld [vmem:[#allocation5 + $0x28] sm:$0xff]   ;;  %v739_v4 = vld [vmem:[#allocation7 + $0x38] sm:$0xff]   ;;  %v734_v5 = vld [vmem:[#allocation5 + $0x20] sm:$0xff]   ;;  %s906_s16 = smov [#allocation11]  }
  0x3e   :  { %661 = vmatprep.subr.bf16.mxu1 %v904_v0  ;;  %677 = vmatprep.mubr.msk.bf16.mxu1 %vm905_vm0, %v904_v0  ;;  %v740_v6 = vld [vmem:[#allocation7 + $0x30] sm:$0xff]   ;;  %v735_v7 = vld [vmem:[#allocation5 + $0x18] sm:$0xff]   ;;  %v741_v8 = vld [vmem:[#allocation7 + $0x28] sm:$0xff]   ;;  %s558_s17 = sshll.u32 %s906_s16, 4  ;;  %s559_s17 = int_to_ptr.vmem [resolvable:$true] %s558_s17 }
  0x3f   :  { %642 = vmatpush3.bf16.msra.mxu0 %v731_v1  ;;  %662 = vmatpush3.bf16.msra.mxu1 %v739_v4  ;;  %v736_v9 = vld [vmem:[#allocation5 + $0x10] sm:$0xff]   ;;  %v737_v10 = vld [vmem:[#allocation5 + $0x8] sm:$0xff]   ;;  %v738_v11 = vld [vmem:[#allocation5] sm:$0xff]   ;;  %p874_p12 = scmp.lt.s32.totalorder %s559_s17, %s559_s17 }
  0x40   :  { %643 = vmatprep.subr.bf16.mxu0 %v904_v0  ;;  %663 = vmatprep.subr.bf16.mxu1 %v904_v0  ;;  %v100_v12 = vld [vmem:[#allocation2] sm:$0xf]  ;;  %v742_v13 = vld [vmem:[#allocation7 + $0x20] sm:$0xff]   ;;  %v744_v15 = vld [vmem:[#allocation7 + $0x10] sm:$0xff]  }
  0x41   :  { %v743_v14 = vld [vmem:[#allocation7 + $0x18] sm:$0xff]   ;;  %v745_v16 = vld [vmem:[#allocation7 + $0x8] sm:$0xff]   ;;  %v746_v17 = vld [vmem:[#allocation7] sm:$0xff]  }
  0x42   :  { %v747_v18 = vld [vmem:[#allocation8 + $0x38] sm:$0xff]   ;;  %v748_v19 = vld [vmem:[#allocation8 + $0x30] sm:$0xff]   ;;  %v749_v20 = vld [vmem:[#allocation8 + $0x28] sm:$0xff]  }
  0x43   :  { %644 = vmatpush3.bf16.msra.mxu0 %v732_v2  ;;  %664 = vmatpush3.bf16.msra.mxu1 %v740_v6  ;;  %v569_v21 = vld [vmem:[%s1041_s2] ss:$0 sm:$0xff]  ;;  %v750_v29 = vld [vmem:[#allocation8 + $0x20] sm:$0xff]   ;;  %v752_v31 = vld [vmem:[#allocation8 + $0x10] sm:$0xff]  }
  0x44   :  { %645 = vmatprep.subr.bf16.mxu0 %v904_v0  ;;  %665 = vmatprep.subr.bf16.mxu1 %v904_v0  ;;  %v751_v30 = vld [vmem:[#allocation8 + $0x18] sm:$0xff]   ;;  %v753_v32 = vld [vmem:[#allocation8 + $0x8] sm:$0xff]   ;;  %v754_v33 = vld [vmem:[#allocation8] sm:$0xff]  }
  0x45   :  { %v755_v34 = vld [vmem:[#allocation10 + $0x38] sm:$0xff]   ;;  %v756_v35 = vld [vmem:[#allocation10 + $0x30] sm:$0xff]   ;;  %v757_v36 = vld [vmem:[#allocation10 + $0x28] sm:$0xff]  }
  0x46   :  { %v578_v37 = vld [vmem:[%s1043_s4] ss:$0 sm:$0xff]  ;;  %v758_v45 = vld [vmem:[#allocation10 + $0x20] sm:$0xff]   ;;  %v760_v47 = vld [vmem:[#allocation10 + $0x10] sm:$0xff]  }
  0x47   :  { %646 = vmatpush3.bf16.msra.mxu0 %v733_v3  ;;  %666 = vmatpush3.bf16.msra.mxu1 %v741_v8  ;;  %v759_v46 = vld [vmem:[#allocation10 + $0x18] sm:$0xff]   ;;  %v761_v48 = vld [vmem:[#allocation10 + $0x8] sm:$0xff]   ;;  %v762_v49 = vld [vmem:[#allocation10] sm:$0xff]  }
  0x48   :  { %647 = vmatprep.subr.bf16.mxu0 %v904_v0  ;;  %667 = vmatprep.subr.bf16.mxu1 %v904_v0  ;;  %v587_v50 = vld [vmem:[%s1045_s6] ss:$0 sm:$0xff]  ;;  %s869_s6 = scalar_lea.vmem %s559_s17, 128 }
  0x49   :  { %v596_v58 = vld [vmem:[%s1047_s8] ss:$0 sm:$0xff]  ;;  %p870_p11 = scmp.ne.s32.totalorder %s559_s17, %s869_s6  ;;  %p875_p13 = scmp.lt.s32.totalorder %s869_s6, %s869_s6 }
  0x4b   :  { %648 = vmatpush3.bf16.msra.mxu0 %v734_v5  ;;  %668 = vmatpush3.bf16.msra.mxu1 %v742_v13  ;;  %p876_p0 = por %p875_p13, %p874_p12 }
  0x4c   :  { %649 = vmatprep.subr.bf16.mxu0 %v904_v0  ;;  %669 = vmatprep.subr.bf16.mxu1 %v904_v0 }
  0x4d   :  { %p877_p1 = pnand %p876_p0, %p870_p11 }
  0x4f   :  { %650 = vmatpush3.bf16.msra.mxu0 %v735_v7  ;;  %670 = vmatpush3.bf16.msra.mxu1 %v743_v14 }
  0x50   :  { %651 = vmatprep.subr.bf16.mxu0 %v904_v0  ;;  %671 = vmatprep.subr.bf16.mxu1 %v904_v0 }
  0x53   :  { %652 = vmatpush3.bf16.msra.mxu0 %v736_v9  ;;  %672 = vmatpush3.bf16.msra.mxu1 %v744_v15 }
  0x54   :  { %653 = vmatprep.subr.bf16.mxu0 %v904_v0  ;;  %673 = vmatprep.subr.bf16.mxu1 %v904_v0 }
  0x57   :  { %654 = vmatpush3.bf16.msra.mxu0 %v737_v10  ;;  %674 = vmatpush3.bf16.msra.mxu1 %v745_v16 }
  0x58   :  { %655 = vmatprep.subr.bf16.mxu0 %v904_v0  ;;  %675 = vmatprep.subr.bf16.mxu1 %v904_v0 }
  0x5b   :  { %656 = vmatpush3.bf16.msra.mxu0 %v738_v11  ;;  %676 = vmatpush3.bf16.msra.mxu1 %v746_v17 }
  0x5c   :  { %681 = vmatprep.subr.bf16.mxu0 %v904_v0  ;;  %701 = vmatprep.subr.bf16.mxu1 %v904_v0 }
  0x5e   :  { %658 = vmatmul.mubr.bf16.vlgmr.msra.gmra.mxu0 %v100_v12 }
  0x5f   :  { %697 = vmatprep.mubr.msk.bf16.mxu0 %vm905_vm0, %v904_v0  ;;  %682 = vmatpush3.bf16.msra.mxu0 %v747_v18 }
  0x60   :  { %683 = vmatprep.subr.bf16.mxu0 %v904_v0 }
  0x63   :  { %684 = vmatpush3.bf16.msra.mxu0 %v748_v19 }
  0x64   :  { %685 = vmatprep.subr.bf16.mxu0 %v904_v0 }
  0x67   :  { %686 = vmatpush3.bf16.msra.mxu0 %v749_v20 }
  0x68   :  { %687 = vmatprep.subr.bf16.mxu0 %v904_v0 }
  0x6b   :  { %688 = vmatpush3.bf16.msra.mxu0 %v750_v29 }
  0x6c   :  { %689 = vmatprep.subr.bf16.mxu0 %v904_v0 }
  0x6f   :  { %690 = vmatpush3.bf16.msra.mxu0 %v751_v30 }
  0x70   :  { %691 = vmatprep.subr.bf16.mxu0 %v904_v0 }
  0x73   :  { %692 = vmatpush3.bf16.msra.mxu0 %v752_v31 }
  0x74   :  { %693 = vmatprep.subr.bf16.mxu0 %v904_v0 }
  0x77   :  { %694 = vmatpush3.bf16.msra.mxu0 %v753_v32 }
  0x78   :  { %695 = vmatprep.subr.bf16.mxu0 %v904_v0 }
  0x7b   :  { %696 = vmatpush3.bf16.msra.mxu0 %v754_v33 }
 0x11e   :  { %v206_v22 = vpop.f32.mrf.mxu0 }
 0x11f   :  { %v207_v23 = vadd.f32 %v569_v21, %v206_v22 }
 0x120   :  { %v659_v24 = vpop.f32.mrf.mxu0 }
 0x121   :  { %763 = vtanh.f32 %v207_v23 }
 0x122   :  { %v209_v25 = vpop.f32.mrf.mxu0 }
 0x124   :  { %v660_v26 = vpop.f32.mrf.mxu0 }
 0x12e   :  { %v764_v27 = vpop.eup %763 }
 0x12f   :  { %v213_v28 = vpack.c.bf16 %v764_v27, %v764_v27 }
 0x131   :  { %678 = vmatmul.mubr.bf16.vlgmr.msra.gmra.mxu1 %v213_v28 }
 0x132   :  { %717 = vmatprep.mubr.msk.bf16.mxu1 %vm905_vm0, %v904_v0  ;;  %702 = vmatpush3.bf16.msra.mxu1 %v755_v34 }
 0x133   :  { %703 = vmatprep.subr.bf16.mxu1 %v904_v0 }
 0x136   :  { %704 = vmatpush3.bf16.msra.mxu1 %v756_v35 }
 0x137   :  { %705 = vmatprep.subr.bf16.mxu1 %v904_v0 }
 0x13a   :  { %706 = vmatpush3.bf16.msra.mxu1 %v757_v36 }
 0x13b   :  { %707 = vmatprep.subr.bf16.mxu1 %v904_v0 }
 0x13e   :  { %708 = vmatpush3.bf16.msra.mxu1 %v758_v45 }
 0x13f   :  { %709 = vmatprep.subr.bf16.mxu1 %v904_v0 }
 0x142   :  { %710 = vmatpush3.bf16.msra.mxu1 %v759_v46 }
 0x143   :  { %711 = vmatprep.subr.bf16.mxu1 %v904_v0 }
 0x146   :  { %712 = vmatpush3.bf16.msra.mxu1 %v760_v47 }
 0x147   :  { %713 = vmatprep.subr.bf16.mxu1 %v904_v0 }
 0x14a   :  { %714 = vmatpush3.bf16.msra.mxu1 %v761_v48 }
 0x14b   :  { %715 = vmatprep.subr.bf16.mxu1 %v904_v0 }
 0x14e   :  { %716 = vmatpush3.bf16.msra.mxu1 %v762_v49 }
 0x1f1   :  { %v319_v38 = vpop.f32.mrf.mxu1 }
 0x1f2   :  { %v320_v39 = vadd.f32 %v578_v37, %v319_v38 }
 0x1f3   :  { %v679_v40 = vpop.f32.mrf.mxu1 }
 0x1f4   :  { %765 = vtanh.f32 %v320_v39 }
 0x1f5   :  { %v322_v41 = vpop.f32.mrf.mxu1 }
 0x1f7   :  { %v680_v42 = vpop.f32.mrf.mxu1 }
 0x201   :  { %v766_v43 = vpop.eup %765 }
 0x202   :  { %v326_v44 = vpack.c.bf16 %v766_v43, %v766_v43 }
 0x204   :  { %698 = vmatmul.mubr.bf16.vlgmr.msra.gmra.mxu0 %v326_v44 }
 0x2c4   :  { %v432_v51 = vpop.f32.mrf.mxu0 }
 0x2c5   :  { %v433_v52 = vadd.f32 %v587_v50, %v432_v51 }
 0x2c6   :  { %v699_v53 = vpop.f32.mrf.mxu0 }
 0x2c7   :  { %767 = vtanh.f32 %v433_v52 }
 0x2c8   :  { %v435_v54 = vpop.f32.mrf.mxu0 }
 0x2ca   :  { %v700_v55 = vpop.f32.mrf.mxu0 }
 0x2d4   :  { %v768_v56 = vpop.eup %767 }
 0x2d5   :  { %v439_v57 = vpack.c.bf16 %v768_v56, %v768_v56 }
 0x2d7   :  { %718 = vmatmul.mubr.bf16.vlgmr.msra.gmra.mxu1 %v439_v57 }
 0x397   :  { %v545_v59 = vpop.f32.mrf.mxu1 }
 0x398   :  { %v546_v60 = vadd.f32 %v596_v58, %v545_v59 }
 0x399   :  { %v719_v61 = vpop.f32.mrf.mxu1 }
 0x39a   :  { %551 = vst [vmem:[#allocation11] sm:$0xff] %v546_v60 }
 0x39b   :  { %v548_v62 = vpop.f32.mrf.mxu1 }
 0x39c   :  { %880 = shalt.err (!%p877_p1)
}
 0x39d   :  { %561 = dma.vmem_to_hbm [thread:$0]  %s559_s17, 128, %s1048_s9, [#allocation4]   ;;  %v720_v63 = vpop.f32.mrf.mxu1 }
 0x39e   :  { %895 = dma.done.wait [#allocation4], 128  }
 0x39f   :  { %896 = vsyncadd [#allocation4], 4294967168 }
 0x3a0   :  { %565 = vsyncpa [#allocation3], 1 }
 0x3a1   :  { %566 = vsyncpa [#allocation6], 1 }
 0x3a2   :  { %567 = vsyncpa [#allocation9], 1 }
 0x3a3   :  { %568 = vsyncpa [#allocation4], 1 }

</bundles_post_ra>
